<compile_context>
chip_gen: v7x
topology: tpu7x:2x2x1
jax: 0.10.0
libtpu: 0.0.40
codegen_flags: <defaults>
</compile_context>

<pallas_src>
import functools

import numpy as np
import jax
import jax.numpy as jnp
from jax.experimental import pallas as pl
from jax.experimental.pallas import tpu as pltpu

NUM_TRAIN_T = 1000
INFER_STEPS = 5
LANE = 128
BN_EPS = 1e-5
ACT_DTYPE = jnp.bfloat16          # HBM storage dtype for (M, C) activations

# Static DDIM scheduler table (host-side numpy -> per-step Python floats).
_BETAS = np.linspace(1e-4, 0.02, NUM_TRAIN_T, dtype=np.float32)
_ALPHAS_CUMPROD = np.cumprod(1.0 - _BETAS).astype(np.float32)


# --------------------------------------------------------------------------
# Per-generation tuning (perf review: v5e/v6e can use much bigger tiles/VMEM)
# --------------------------------------------------------------------------
def _tpu_vmem_phys_bytes():
    try:
        info = pltpu.get_tpu_info()
        for attr in ("vmem_capacity_bytes", "vmem_bytes", "vmem_size_bytes"):
            v = getattr(info, attr, None)
            if v:
                return int(v)
    except Exception:
        pass
    return 64 << 20          # conservative (v7x-sized) fallback


_VMEM_PHYS = _tpu_vmem_phys_bytes()
if _VMEM_PHYS >= (128 << 20):            # v5e / v6e: 128 MiB physical VMEM
    VMEM_LIMIT_BYTES = 96 << 20
    TILE_M_CAP = 1024
else:                                    # v7x (64 MiB) or unknown
    VMEM_LIMIT_BYTES = 32 << 20
    TILE_M_CAP = 512


def _round_up(x, m):
    return (x + m - 1) // m * m


def _pick_tile_m(rows, cap=None):
    """Largest row tile (multiple of 8, or full extent) dividing `rows`."""
    cap = TILE_M_CAP if cap is None else cap
    if rows <= cap:
        return rows                      # full extent block
    t = cap - (cap % 8)
    while t >= 8:
        if rows % t == 0:
            return t
        t -= 8
    return rows                          # unreachable when rows % 8 == 0


def _cparams(dimension_semantics):
    return pltpu.CompilerParams(dimension_semantics=dimension_semantics,
                                vmem_limit_bytes=VMEM_LIMIT_BYTES)


def _nbytes(*arrays):
    return int(sum(a.size * jnp.dtype(a.dtype).itemsize for a in arrays))


# --------------------------------------------------------------------------
# Single-buffering of grid-invariant blocks (probed once for compatibility)
# --------------------------------------------------------------------------
@functools.lru_cache(maxsize=1)
def _buffered_supported():
    try:
        def k(x_ref, o_ref):
            o_ref[...] = x_ref[...] * 2.0
        fn = pl.pallas_call(
            k, grid=(2,),
            in_specs=[pl.BlockSpec((8, 128), lambda i: (0, 0),
                                   pipeline_mode=pl.Buffered(1))],
            out_specs=pl.BlockSpec((8, 128), lambda i: (i, 0)),
            out_shape=jax.ShapeDtypeStruct((16, 128), jnp.float32))
        jax.block_until_ready(fn(jnp.ones((8, 128), jnp.float32)))
        return True
    except Exception:
        return False


def _spec(shape, index_map, *, constant=False):
    """BlockSpec; grid-invariant blocks get single-buffering when supported."""
    if constant and _buffered_supported():
        return pl.BlockSpec(shape, index_map, pipeline_mode=pl.Buffered(1))
    return pl.BlockSpec(shape, index_map)


# --------------------------------------------------------------------------
# Pallas kernels (tiled path)
# --------------------------------------------------------------------------
def _mm_partial_kernel(*refs, n_x, with_stats):
    """y = sum_i x_i @ w_i + bias_row   (+ per-tile partial sum / sumsq of y).

    Partial stats are emitted per grid step (no cross-step accumulator), so
    every grid axis can be marked "parallel" (v7x megacore safe)."""
    x_refs = refs[:n_x]
    w_refs = refs[n_x:2 * n_x]
    b_ref = refs[2 * n_x]
    y_ref = refs[2 * n_x + 1]

    y = b_ref[...]                                          # (1, Co) f32
    for x_ref, w_ref in zip(x_refs, w_refs):                # bf16 x bf16 -> f32 MXU
        y = y + jnp.dot(x_ref[...], w_ref[...], preferred_element_type=jnp.float32)
    y_ref[...] = y.astype(y_ref.dtype)

    if with_stats:
        psum_ref = refs[2 * n_x + 2]
        psq_ref = refs[2 * n_x + 3]
        psum_ref[...] = jnp.sum(y, axis=0, keepdims=True)[None]
        psq_ref[...] = jnp.sum(y * y, axis=0, keepdims=True)[None]


def _bn_relu_mm_partial_kernel(x_ref, sc_ref, sh_ref, w_ref, b_ref,
                               y_ref, psum_ref, psq_ref):
    """h = relu(bn(x)); y = h @ w + b; emit per-tile partial BN stats of y."""
    h = jnp.maximum(x_ref[...].astype(jnp.float32) * sc_ref[...] + sh_ref[...], 0.0)
    y = b_ref[...] + jnp.dot(h.astype(jnp.bfloat16), w_ref[...],
                             preferred_element_type=jnp.float32)
    y_ref[...] = y.astype(y_ref.dtype)
    psum_ref[...] = jnp.sum(y, axis=0, keepdims=True)[None]
    psq_ref[...] = jnp.sum(y * y, axis=0, keepdims=True)[None]


def _bn_relu_mm_ddim_kernel(x_ref, sc_ref, sh_ref, w_ref, b_ref, img_ref,
                            coef_ref, o_ref):
    """eps = relu(bn(x)) @ w + b ;  image' = c_samp*image + c_eps*eps."""
    h = jnp.maximum(x_ref[...].astype(jnp.float32) * sc_ref[...] + sh_ref[...], 0.0)
    eps = b_ref[...] + jnp.dot(h.astype(jnp.bfloat16), w_ref[...],
                               preferred_element_type=jnp.float32)
    o_ref[...] = (coef_ref[0] * img_ref[...].astype(jnp.float32)
                  + coef_ref[1] * eps).astype(o_ref.dtype)


def _bn_relu_mm_mse_kernel(x_ref, sc_ref, sh_ref, w_ref, b_ref, n_ref, sse_ref):
    """noise_pred = relu(bn(x)) @ w + b ; emit per-tile partial SSE."""
    h = jnp.maximum(x_ref[...].astype(jnp.float32) * sc_ref[...] + sh_ref[...], 0.0)
    pred = b_ref[...] + jnp.dot(h.astype(jnp.bfloat16), w_ref[...],
                                preferred_element_type=jnp.float32)
    d = pred - n_ref[...].astype(jnp.float32)
    sse_ref[...] = jnp.sum(d * d).reshape(1, 1, 1)


def _bn_affine_kernel(x_ref, sc_ref, sh_ref, o_ref):
    o_ref[...] = (x_ref[...].astype(jnp.float32) * sc_ref[...]
                  + sh_ref[...]).astype(o_ref.dtype)


# --------------------------------------------------------------------------
# Pallas kernels (fully fused diffusion-model pass; whole M resident in VMEM)
# --------------------------------------------------------------------------
def _bn_relu_full(y, gamma, beta, inv_m):
    mean = jnp.sum(y, axis=0, keepdims=True) * inv_m
    var = jnp.maximum(jnp.sum(y * y, axis=0, keepdims=True) * inv_m - mean * mean, 0.0)
    return jnp.maximum((y - mean) * (gamma * jax.lax.rsqrt(var + BN_EPS)) + beta, 0.0)


def _diffusion_trunk(x1, x2, wrefs, inv_m):
    """conv1(+concat elim) -> BN1 -> ReLU -> conv2 -> BN2 -> ReLU -> conv3."""
    (w1a, w1b, b1, g1, be1, w2, b2, g2, be2, w3, b3) = wrefs
    y1 = (b1[...]
          + jnp.dot(x1, w1a[...], preferred_element_type=jnp.float32)
          + jnp.dot(x2, w1b[...], preferred_element_type=jnp.float32))
    h1 = _bn_relu_full(y1, g1[...], be1[...], inv_m)
    y2 = b2[...] + jnp.dot(h1.astype(jnp.bfloat16), w2[...],
                           preferred_element_type=jnp.float32)
    h2 = _bn_relu_full(y2, g2[...], be2[...], inv_m)
    return b3[...] + jnp.dot(h2.astype(jnp.bfloat16), w3[...],
                             preferred_element_type=jnp.float32)


def _ddim_step_fused_kernel(img_ref, s_ref, w1a, w1b, b1, g1, be1,
                            w2, b2, g2, be2, w3, b3, coef_ref, out_ref, *, m_total):
    eps = _diffusion_trunk(img_ref[...], s_ref[...],
                           (w1a, w1b, b1, g1, be1, w2, b2, g2, be2, w3, b3),
                           1.0 / m_total)
    out_ref[...] = (coef_ref[0] * img_ref[...].astype(jnp.float32)
                    + coef_ref[1] * eps).astype(out_ref.dtype)


def _ddim_loss_fused_kernel(x1_ref, x2_ref, w1a, w1b, b1, g1, be1,
                            w2, b2, g2, be2, w3, b3, noise_ref, sse_ref, *, m_total):
    pred = _diffusion_trunk(x1_ref[...], x2_ref[...],
                            (w1a, w1b, b1, g1, be1, w2, b2, g2, be2, w3, b3),
                            1.0 / m_total)
    d = pred - noise_ref[...].astype(jnp.float32)
    sse_ref[...] = jnp.sum(d * d).reshape(1, 1)


# --------------------------------------------------------------------------
# Host-side BN fold of partial statistics (tiny XLA op)
# --------------------------------------------------------------------------
def _bn_fold(psum, psq, gamma, beta, m_total):
    mean = jnp.sum(psum, axis=0) / m_total          # (1, Co)
    ex2 = jnp.sum(psq, axis=0) / m_total
    var = jnp.maximum(ex2 - mean * mean, 0.0)        # clamp cancellation
    scale = gamma * jax.lax.rsqrt(var + BN_EPS)
    shift = beta - mean * scale
    return scale, shift


# --------------------------------------------------------------------------
# Wrappers (grid / BlockSpec plumbing)
# --------------------------------------------------------------------------
def fused_matmul(xs, ws, bias_row, gamma=None, beta=None, *, with_stats,
                 out_dtype=ACT_DTYPE):
    """1x1 conv as tiled (M, Ci) @ (Ci, Co), optional second operand pair
    (concat elimination), single folded bias row, optional training-BN stats
    (returned already folded to (scale, shift))."""
    n_x = len(xs)
    M = xs[0].shape[0]
    Co = ws[0].shape[1]
    tile = _pick_tile_m(M)
    n_tiles = M // tile

    in_specs = [pl.BlockSpec((tile, x.shape[1]), lambda i: (i, 0)) for x in xs]
    in_specs += [_spec(w.shape, lambda i: (0, 0), constant=True) for w in ws]
    in_specs += [_spec((1, Co), lambda i: (0, 0), constant=True)]
    inputs = list(xs) + list(ws) + [bias_row.astype(jnp.float32)]

    y_struct = jax.ShapeDtypeStruct((M, Co), out_dtype)
    y_spec = pl.BlockSpec((tile, Co), lambda i: (i, 0))
    kernel = functools.partial(_mm_partial_kernel, n_x=n_x, with_stats=with_stats)
    cost = pl.CostEstimate(
        flops=int(2 * M * sum(x.shape[1] for x in xs) * Co), transcendentals=0,
        bytes_accessed=_nbytes(*inputs) + int(M * Co * jnp.dtype(out_dtype).itemsize))

    if not with_stats:
        y = pl.pallas_call(
            kernel, grid=(n_tiles,), in_specs=in_specs, out_specs=y_spec,
            out_shape=y_struct, compiler_params=_cparams(("parallel",)),
            cost_estimate=cost)(*inputs)
        return y

    stat_struct = jax.ShapeDtypeStruct((n_tiles, 1, Co), jnp.float32)
    stat_spec = pl.BlockSpec((1, 1, Co), lambda i: (i, 0, 0))
    y, psum, psq = pl.pallas_call(
        kernel, grid=(n_tiles,), in_specs=in_specs,
        out_specs=(y_spec, stat_spec, stat_spec),
        out_shape=(y_struct, stat_struct, stat_struct),
        compiler_params=_cparams(("parallel",)), cost_estimate=cost)(*inputs)
    scale, shift = _bn_fold(psum, psq, gamma, beta, M)
    return y, scale, shift


def bn_relu_matmul_stats(x, bn_scale, bn_shift, w, b, gamma, beta,
                         out_dtype=ACT_DTYPE):
    M, Ci = x.shape
    Co = w.shape[1]
    tile = _pick_tile_m(M)
    n_tiles = M // tile
    stat_struct = jax.ShapeDtypeStruct((n_tiles, 1, Co), jnp.float32)
    stat_spec = pl.BlockSpec((1, 1, Co), lambda i: (i, 0, 0))
    cost = pl.CostEstimate(
        flops=int(2 * M * Ci * Co), transcendentals=0,
        bytes_accessed=_nbytes(x, w) + int(M * Co * jnp.dtype(out_dtype).itemsize))
    y, psum, psq = pl.pallas_call(
        _bn_relu_mm_partial_kernel, grid=(n_tiles,),
        in_specs=[pl.BlockSpec((tile, Ci), lambda i: (i, 0)),
                  _spec((1, Ci), lambda i: (0, 0), constant=True),
                  _spec((1, Ci), lambda i: (0, 0), constant=True),
                  _spec((Ci, Co), lambda i: (0, 0), constant=True),
                  _spec((1, Co), lambda i: (0, 0), constant=True)],
        out_specs=(pl.BlockSpec((tile, Co), lambda i: (i, 0)), stat_spec, stat_spec),
        out_shape=(jax.ShapeDtypeStruct((M, Co), out_dtype), stat_struct, stat_struct),
        compiler_params=_cparams(("parallel",)), cost_estimate=cost,
    )(x, bn_scale, bn_shift, w, b)
    scale, shift = _bn_fold(psum, psq, gamma, beta, M)
    return y, scale, shift


def bn_relu_matmul_ddim(x, bn_scale, bn_shift, w, b, image, coefs,
                        out_dtype=ACT_DTYPE):
    M, Ci = x.shape
    Co = w.shape[1]
    tile = _pick_tile_m(M)
    n_tiles = M // tile
    cost = pl.CostEstimate(
        flops=int(2 * M * Ci * Co), transcendentals=0,
        bytes_accessed=_nbytes(x, w, image) + int(M * Co * jnp.dtype(out_dtype).itemsize))
    return pl.pallas_call(
        _bn_relu_mm_ddim_kernel, grid=(n_tiles,),
        in_specs=[pl.BlockSpec((tile, Ci), lambda i: (i, 0)),
                  _spec((1, Ci), lambda i: (0, 0), constant=True),
                  _spec((1, Ci), lambda i: (0, 0), constant=True),
                  _spec((Ci, Co), lambda i: (0, 0), constant=True),
                  _spec((1, Co), lambda i: (0, 0), constant=True),
                  pl.BlockSpec((tile, Co), lambda i: (i, 0)),
                  pl.BlockSpec(memory_space=pltpu.MemorySpace.SMEM)],
        out_specs=pl.BlockSpec((tile, Co), lambda i: (i, 0)),
        out_shape=jax.ShapeDtypeStruct((M, Co), out_dtype),
        compiler_params=_cparams(("parallel",)), cost_estimate=cost,
    )(x, bn_scale, bn_shift, w, b, image, coefs)


def bn_relu_matmul_mse(x, bn_scale, bn_shift, w, b, noise):
    M, Ci = x.shape
    Co = w.shape[1]
    tile = _pick_tile_m(M)
    n_tiles = M // tile
    cost = pl.CostEstimate(flops=int(2 * M * Ci * Co), transcendentals=0,
                           bytes_accessed=_nbytes(x, w, noise))
    partial = pl.pallas_call(
        _bn_relu_mm_mse_kernel, grid=(n_tiles,),
        in_specs=[pl.BlockSpec((tile, Ci), lambda i: (i, 0)),
                  _spec((1, Ci), lambda i: (0, 0), constant=True),
                  _spec((1, Ci), lambda i: (0, 0), constant=True),
                  _spec((Ci, Co), lambda i: (0, 0), constant=True),
                  _spec((1, Co), lambda i: (0, 0), constant=True),
                  pl.BlockSpec((tile, Co), lambda i: (i, 0))],
        out_specs=pl.BlockSpec((1, 1, 1), lambda i: (i, 0, 0)),
        out_shape=jax.ShapeDtypeStruct((n_tiles, 1, 1), jnp.float32),
        compiler_params=_cparams(("parallel",)), cost_estimate=cost,
    )(x, bn_scale, bn_shift, w, b, noise)
    return jnp.sum(partial)


def bn_affine(x, bn_scale, bn_shift, out_dtype=ACT_DTYPE):
    M, C = x.shape
    tile = _pick_tile_m(M)
    n_tiles = M // tile
    return pl.pallas_call(
        _bn_affine_kernel, grid=(n_tiles,),
        in_specs=[pl.BlockSpec((tile, C), lambda i: (i, 0)),
                  _spec((1, C), lambda i: (0, 0), constant=True),
                  _spec((1, C), lambda i: (0, 0), constant=True)],
        out_specs=pl.BlockSpec((tile, C), lambda i: (i, 0)),
        out_shape=jax.ShapeDtypeStruct((M, C), out_dtype),
        compiler_params=_cparams(("parallel",)),
    )(x, bn_scale, bn_shift)


# ----- fully fused diffusion-model pass (single pallas_call, whole M in VMEM)
def _fused_diffusion_fits(M, Ctp, C2p):
    acts = 3 * M * Ctp * 2                                       # in/out bf16
    inter = 2 * M * C2p * 4 + 2 * M * C2p * 2 + M * Ctp * 4      # y1,y2,h1,h2,eps
    wts = (2 * Ctp * C2p + C2p * C2p + C2p * Ctp) * 2            # bf16 weights
    est = 2 * acts + inter + 2 * wts                             # slack for copies
    return est <= int(VMEM_LIMIT_BYTES * 0.7)


def _diffusion_weight_inputs(p, bias_row):
    arrs = [p['dm_w1a'], p['dm_w1b'], bias_row.astype(jnp.float32),
            p['dm_g1'], p['dm_be1'], p['dm_w2'], p['dm_b2'], p['dm_g2'],
            p['dm_be2'], p['dm_w3'], p['dm_b3']]
    specs = [_spec(a.shape, lambda i: (0, 0), constant=True) for a in arrs]
    return arrs, specs


def _diffusion_flops(M, Ctp, C2p):
    return int(2 * M * C2p * (3 * Ctp + C2p))


def ddim_step_fused(image, s, p, bias_row, coefs, out_dtype=ACT_DTYPE):
    M, Ctp = image.shape
    C2p = p['dm_w2'].shape[0]
    warr, wspecs = _diffusion_weight_inputs(p, bias_row)
    full = lambda a: pl.BlockSpec(a.shape, lambda i: (0, 0))
    cost = pl.CostEstimate(flops=_diffusion_flops(M, Ctp, C2p), transcendentals=0,
                           bytes_accessed=_nbytes(image, s, *warr) + 2 * M * Ctp)
    return pl.pallas_call(
        functools.partial(_ddim_step_fused_kernel, m_total=M),
        grid=(1,),
        in_specs=[full(image), full(s)] + wspecs
                 + [pl.BlockSpec(memory_space=pltpu.MemorySpace.SMEM)],
        out_specs=pl.BlockSpec((M, Ctp), lambda i: (0, 0)),
        out_shape=jax.ShapeDtypeStruct((M, Ctp), out_dtype),
        compiler_params=_cparams(("arbitrary",)), cost_estimate=cost,
    )(image, s, *warr, coefs)


def ddim_loss_fused(noisy, refined_in, p, noise):
    M, Ctp = noisy.shape
    C2p = p['dm_w2'].shape[0]
    warr, wspecs = _diffusion_weight_inputs(p, p['dm_b1'])
    full = lambda a: pl.BlockSpec(a.shape, lambda i: (0, 0))
    cost = pl.CostEstimate(flops=_diffusion_flops(M, Ctp, C2p), transcendentals=0,
                           bytes_accessed=_nbytes(noisy, refined_in, noise, *warr))
    sse = pl.pallas_call(
        functools.partial(_ddim_loss_fused_kernel, m_total=M),
        grid=(1,),
        in_specs=[full(noisy), full(refined_in)] + wspecs + [full(noise)],
        out_specs=pl.BlockSpec((1, 1), lambda i: (0, 0)),
        out_shape=jax.ShapeDtypeStruct((1, 1), jnp.float32),
        compiler_params=_cparams(("arbitrary",)), cost_estimate=cost,
    )(noisy, refined_in, *warr, noise)
    return sse[0, 0]


# --------------------------------------------------------------------------
# Layout helpers
# --------------------------------------------------------------------------
def nchw_to_mc(x, c_pad, dtype):
    N, C, H, W = x.shape
    x = jnp.transpose(x, (0, 2, 3, 1)).reshape(N * H * W, C)
    if c_pad > C:
        x = jnp.pad(x, ((0, 0), (0, c_pad - C)))
    return x.astype(dtype)


def mc_to_nchw(x, N, H, W, c_real):
    x = x[:, :c_real].astype(jnp.float32)
    return jnp.transpose(x.reshape(N, H, W, c_real), (0, 3, 1, 2))


def _pad2(a, rows, cols):
    return jnp.pad(a, ((0, rows - a.shape[0]), (0, cols - a.shape[1])))


# --------------------------------------------------------------------------
# Deterministic parameter init (synthetic; shapes follow DiffKD.__init__)
# --------------------------------------------------------------------------
def init_params(key, student_channels, teacher_channels):
    Cs, Ct = student_channels, teacher_channels
    Cs_p, Ct_p = _round_up(Cs, LANE), _round_up(Ct, LANE)
    C2_p = _round_up(2 * Ct, LANE)
    keys = iter(jax.random.split(key, 32))

    def w(shape, scale=0.1):
        return jax.random.normal(next(keys), shape, jnp.float32) * scale

    def wmat(a, rows, cols):            # conv weights shipped bf16 (perf review)
        return _pad2(a, rows, cols).astype(jnp.bfloat16)

    def vec(v, c):
        return _pad2(v, 1, c)

    p = {}
    # trans: Conv2d(Cs, Ct, 1)
    p['trans_w'] = wmat(w((Cs, Ct)), Cs_p, Ct_p)
    p['trans_b'] = vec(w((1, Ct), 0.01), Ct_p)
    # NoiseAdapter (kernel_size=1 branch)
    p['na_w1'] = wmat(w((Ct, 2 * Ct)), Ct_p, C2_p)
    p['na_b1'] = vec(w((1, 2 * Ct), 0.01), C2_p)
    p['na_g1'] = vec(jnp.ones((1, 2 * Ct), jnp.float32), C2_p)   # padded gamma == 0
    p['na_be1'] = jnp.zeros((1, C2_p), jnp.float32)
    p['na_w2'] = wmat(w((2 * Ct, Ct)), C2_p, Ct_p)
    p['na_b2'] = vec(w((1, Ct), 0.01), Ct_p)
    p['na_g2'] = vec(jnp.ones((1, Ct), jnp.float32), Ct_p)
    p['na_be2'] = jnp.zeros((1, Ct_p), jnp.float32)
    p['na_lin_w'] = w((Ct, 2))
    p['na_lin_b'] = w((1, 2), 0.01)
    # DiffusionModel(channels_in=2Ct)
    emb = jax.random.normal(next(keys), (1280, 2 * Ct), jnp.float32)
    p['time_emb_a'] = _pad2(emb[:, :Ct], 1280, Ct_p)   # half added to `image` channels
    p['time_emb_b'] = _pad2(emb[:, Ct:], 1280, Ct_p)   # half added to cond channels
    w1 = w((2 * Ct, 2 * Ct))
    p['dm_w1a'] = wmat(w1[:Ct], Ct_p, C2_p)            # concat([image, cond]) eliminated
    p['dm_w1b'] = wmat(w1[Ct:], Ct_p, C2_p)
    p['dm_b1'] = vec(w((1, 2 * Ct), 0.01), C2_p)
    p['dm_g1'] = vec(jnp.ones((1, 2 * Ct), jnp.float32), C2_p)
    p['dm_be1'] = jnp.zeros((1, C2_p), jnp.float32)
    p['dm_w2'] = wmat(w((2 * Ct, 2 * Ct)), C2_p, C2_p)
    p['dm_b2'] = vec(w((1, 2 * Ct), 0.01), C2_p)
    p['dm_g2'] = vec(jnp.ones((1, 2 * Ct), jnp.float32), C2_p)
    p['dm_be2'] = jnp.zeros((1, C2_p), jnp.float32)
    p['dm_w3'] = wmat(w((2 * Ct, Ct)), C2_p, Ct_p)
    p['dm_b3'] = vec(w((1, Ct), 0.01), Ct_p)
    # proj: Conv2d(Ct, Ct, 1) + BatchNorm2d(Ct)
    p['proj_w'] = wmat(w((Ct, Ct)), Ct_p, Ct_p)
    p['proj_b'] = vec(w((1, Ct), 0.01), Ct_p)
    p['proj_g'] = vec(jnp.ones((1, Ct), jnp.float32), Ct_p)
    p['proj_be'] = jnp.zeros((1, Ct_p), jnp.float32)
    return p


# --------------------------------------------------------------------------
# DiffKD forward
# --------------------------------------------------------------------------
def diffkd_forward(p, student_feat, teacher_feat, key):
    N, Cs, H, W = student_feat.shape
    Ct = teacher_feat.shape[1]
    HW, M = H * W, N * H * W
    Cs_p = p['trans_w'].shape[0]
    Ct_p = p['trans_w'].shape[1]
    C2_p = p['dm_w1a'].shape[1]
    ac = _ALPHAS_CUMPROD

    assert HW % 8 == 0 and M % 8 == 0, "H*W must be a multiple of 8"
    use_fused = _fused_diffusion_fits(M, Ct_p, C2_p)

    # ---- trans: Conv2d(Cs, Ct, 1) ----
    s_in = nchw_to_mc(student_feat, Cs_p, ACT_DTYPE)
    s = fused_matmul([s_in], [p['trans_w']], p['trans_b'], with_stats=False)

    # ---- NoiseAdapter ----
    y1, sc1, sh1 = fused_matmul([s], [p['na_w1']], p['na_b1'],
                                gamma=p['na_g1'], beta=p['na_be1'], with_stats=True)
    y2, sc2, sh2 = bn_relu_matmul_stats(y1, sc1, sh1, p['na_w2'], p['na_b2'],
                                        p['na_g2'], p['na_be2'])
    # AdaptiveAvgPool2d(1) commutes with the per-channel BN affine -> pool raw y2.
    # TODO(synk): per-batch pooled sums could be emitted by the layer-2 kernel itself.
    pooled = jnp.mean(y2.astype(jnp.float32).reshape(N, HW, Ct_p), axis=1)
    pooled = pooled * sc2 + sh2
    logits = pooled[:, :Ct] @ p['na_lin_w'] + p['na_lin_b']
    gamma_t = jax.nn.softmax(logits, axis=1)[:, 0]                             # (N,)

    # ---- scheduler.add_noise_diff2 ----
    key, k_noise = jax.random.split(key)
    noise0 = jnp.pad(jax.random.normal(k_noise, (N, HW, Ct), jnp.float32),
                     ((0, 0), (0, 0), (0, Ct_p - Ct))).astype(ACT_DTYPE)
    sa = jnp.sqrt(gamma_t)[:, None, None]
    sb = jnp.sqrt(1.0 - gamma_t)[:, None, None]
    # TODO(synk): this FMA could be fused as a prologue of the first DDIM-step kernel.
    image = (sa * s.astype(jnp.float32).reshape(N, HW, Ct_p)
             + sb * noise0.astype(jnp.float32)).reshape(M, Ct_p).astype(ACT_DTYPE)

    # ---- DDIM loop (set_timesteps(2*inference_steps); second half) ----
    n_infer = 2 * INFER_STEPS
    step_ratio = NUM_TRAIN_T // n_infer
    ts = list(range(0, NUM_TRAIN_T, step_ratio))[::-1]
    ts = ts[len(ts) // 2:]                                                     # [400,300,200,100,0]

    w1a_f32 = p['dm_w1a'].astype(jnp.float32)
    w1b_f32 = p['dm_w1b'].astype(jnp.float32)
    for t in ts:
        # time embedding folded into the layer-1 bias row: (x+e)@W1 = x@W1 + e@W1
        bias_row = (p['dm_b1']
                    + p['time_emb_a'][t][None, :] @ w1a_f32
                    + p['time_emb_b'][t][None, :] @ w1b_f32)                   # (1, C2_p)
        # DDIM step (eta=0, clip_sample=False, use_clipped_model_output=True)
        prev_t = t - step_ratio
        a_t = float(ac[t])
        a_prev = float(ac[prev_t]) if prev_t >= 0 else 1.0
        c_samp = (a_prev / a_t) ** 0.5
        c_eps = (1.0 - a_prev) ** 0.5 - c_samp * (1.0 - a_t) ** 0.5
        coefs = jnp.array([c_samp, c_eps], jnp.float32)

        if use_fused:
            # One pallas_call per step: y1/y2 never leave VMEM.
            image = ddim_step_fused(image, s, p, bias_row, coefs)
        else:
            y1, a1, b1 = fused_matmul([image, s], [p['dm_w1a'], p['dm_w1b']], bias_row,
                                      gamma=p['dm_g1'], beta=p['dm_be1'], with_stats=True)
            y2, a2, b2 = bn_relu_matmul_stats(y1, a1, b1, p['dm_w2'], p['dm_b2'],
                                              p['dm_g2'], p['dm_be2'])
            image = bn_relu_matmul_ddim(y2, a2, b2, p['dm_w3'], p['dm_b3'], image, coefs)

    # ---- proj: Conv1x1 + BN ----
    yp, scp, shp = fused_matmul([image], [p['proj_w']], p['proj_b'],
                                gamma=p['proj_g'], beta=p['proj_be'], with_stats=True)
    refined = bn_affine(yp, scp, shp)                                          # (M, Ct_p)

    # ---- ddim_loss ----
    tch = nchw_to_mc(teacher_feat, Ct_p, jnp.float32)
    key, kn, kt = jax.random.split(key, 3)
    noise = jnp.pad(jax.random.normal(kn, (N, HW, Ct), jnp.float32),
                    ((0, 0), (0, 0), (0, Ct_p - Ct)))                          # (N, HW, Ct_p)
    timesteps = jax.random.randint(kt, (N,), 0, NUM_TRAIN_T)
    a = jnp.asarray(ac)[timesteps]
    sa = jnp.sqrt(a)[:, None, None]
    sb = jnp.sqrt(1.0 - a)[:, None, None]
    # Per-batch time embedding added to the *inputs* (not a per-batch bias) so
    # the loss-path matmuls run with full-size M tiles.
    emb_a = p['time_emb_a'][timesteps]                                         # (N, Ct_p)
    emb_b = p['time_emb_b'][timesteps]
    noisy = (sa * tch.reshape(N, HW, Ct_p) + sb * noise
             + emb_a[:, None, :]).reshape(M, Ct_p).astype(ACT_DTYPE)
    refined_in = (refined.astype(jnp.float32).reshape(N, HW, Ct_p)
                  + emb_b[:, None, :]).reshape(M, Ct_p).astype(ACT_DTYPE)
    noise_bf = noise.reshape(M, Ct_p).astype(ACT_DTYPE)                        # bf16 target

    if use_fused:
        sse = ddim_loss_fused(noisy, refined_in, p, noise_bf)
    else:
        y1, a1, b1 = fused_matmul([noisy, refined_in], [p['dm_w1a'], p['dm_w1b']],
                                  p['dm_b1'], gamma=p['dm_g1'], beta=p['dm_be1'],
                                  with_stats=True)
        y2, a2, b2 = bn_relu_matmul_stats(y1, a1, b1, p['dm_w2'], p['dm_b2'],
                                          p['dm_g2'], p['dm_be2'])
        sse = bn_relu_matmul_mse(y2, a2, b2, p['dm_w3'], p['dm_b3'], noise_bf)
    ddim_loss = sse / (M * Ct)              # padded channels are exactly zero on both sides

    refined_nchw = mc_to_nchw(refined, N, H, W, Ct)
    rec_loss = None                         # use_ae=False
    return refined_nchw, teacher_feat, ddim_loss, rec_loss


# --------------------------------------------------------------------------
if __name__ == "__main__":
    key = jax.random.PRNGKey(0)
    k_params, k_s, k_t, k_fwd = jax.random.split(key, 4)

    student_channels, teacher_channels = 8, 16
    B, H, W = 2, 8, 8

    params = init_params(k_params, student_channels, teacher_channels)
    student = jax.random.normal(k_s, (B, student_channels, H, W), jnp.float32)
    teacher = jax.random.normal(k_t, (B, teacher_channels, H, W), jnp.float32)

    refined, teacher_out, ddim_loss, rec_loss = diffkd_forward(
        params, student, teacher, k_fwd)
    jax.block_until_ready((refined, teacher_out, ddim_loss))

    assert refined.shape == (B, teacher_channels, H, W)
    assert teacher_out.shape == (B, teacher_channels, H, W)
    assert ddim_loss.shape == ()
    assert rec_loss is None
    assert bool(jnp.isfinite(ddim_loss))
    print("KERNEL_OK")
</pallas_src>

<mosaic_0001>
module attributes {stable_mosaic.version = 11 : i64} {
  func.func @k(%arg0: i32, %arg1: memref<8x128xf32, #tpu.memory_space<vmem>>, %arg2: memref<8x128xf32, #tpu.memory_space<vmem>>) attributes {dimension_semantics = [#tpu.dimension_semantics<arbitrary>], iteration_bounds = array<i64: 2>, scalar_prefetch = 0 : i64, scratch_operands = 0 : i64, tpu.core_type = #tpu.core_type<tc>, window_params = [{pipeline_mode = #tpu.pipeline_mode<synchronous>, transform_indices = @transform_0, window_bounds = array<i64: 8, 128>}, {transform_indices = @transform_1, window_bounds = array<i64: 8, 128>}]} {
    %c0 = arith.constant 0 : index
    %c0_0 = arith.constant 0 : index
    %0 = vector.load %arg1[%c0, %c0_0] : memref<8x128xf32, #tpu.memory_space<vmem>>, vector<8x128xf32>
    %cst = arith.constant 2.000000e+00 : f32
    %1 = vector.broadcast %cst : f32 to vector<8x128xf32>
    %2 = arith.mulf %0, %1 : vector<8x128xf32>
    %c0_1 = arith.constant 0 : index
    %c0_2 = arith.constant 0 : index
    %3 = vector.load %arg2[%c0_1, %c0_2] : memref<8x128xf32, #tpu.memory_space<vmem>>, vector<8x128xf32>
    tpu.vector_store %arg2[%c0_1, %c0_2], %2 {strides = array<i32>} : memref<8x128xf32, #tpu.memory_space<vmem>>, vector<8x128xf32>,
    return
  }
  func.func @transform_0(%arg0: i32) -> (i32, i32) {
    %c0_i32 = arith.constant 0 : i32
    %c0_i32_0 = arith.constant 0 : i32
    %c0_i32_1 = arith.constant 0 : i32
    return %c0_i32, %c0_i32_0 : i32, i32
  }
  func.func @transform_1(%arg0: i32) -> (i32, i32) {
    %c0_i32 = arith.constant 0 : i32
    %c0_i32_0 = arith.constant 0 : i32
    return %arg0, %c0_i32 : i32, i32
  }
}

module attributes {stable_mosaic.version = 11 : i64} {
  func.func @_mm_partial_kernel(%arg0: i32, %arg1: memref<128x128xbf16, #tpu.memory_space<vmem>>, %arg2: memref<128x128xbf16, #tpu.memory_space<vmem>>, %arg3: memref<1x128xf32, #tpu.memory_space<vmem>>, %arg4: memref<128x128xbf16, #tpu.memory_space<vmem>>) attributes {dimension_semantics = [#tpu.dimension_semantics<parallel>], iteration_bounds = array<i64: 1>, scalar_prefetch = 0 : i64, scratch_operands = 0 : i64, tpu.core_type = #tpu.core_type<tc>, window_params = [{transform_indices = @transform_0, window_bounds = array<i64: 128, 128>}, {pipeline_mode = #tpu.pipeline_mode<synchronous>, transform_indices = @transform_1, window_bounds = array<i64: 128, 128>}, {pipeline_mode = #tpu.pipeline_mode<synchronous>, transform_indices = @transform_2, window_bounds = array<i64: 1, 128>}, {transform_indices = @transform_3, window_bounds = array<i64: 128, 128>}]} {
    %c0 = arith.constant 0 : index
    %c0_0 = arith.constant 0 : index
    %0 = vector.load %arg3[%c0, %c0_0] : memref<1x128xf32, #tpu.memory_space<vmem>>, vector<1x128xf32>
    %c0_1 = arith.constant 0 : index
    %c0_2 = arith.constant 0 : index
    %1 = vector.load %arg1[%c0_1, %c0_2] : memref<128x128xbf16, #tpu.memory_space<vmem>>, vector<128x128xbf16>
    %c0_3 = arith.constant 0 : index
    %c0_4 = arith.constant 0 : index
    %2 = vector.load %arg2[%c0_3, %c0_4] : memref<128x128xbf16, #tpu.memory_space<vmem>>, vector<128x128xbf16>
    %cst = arith.constant dense<0.000000e+00> : vector<128x128xf32>
    %3 = tpu.matmul %1, %2, %cst {dimension_numbers = #tpu.dot_dimension_numbers<[1], [0], [0], [1], [0, 0, 1, 1], [], []>} : vector<128x128xbf16>, vector<128x128xbf16>, vector<128x128xf32> -> vector<128x128xf32>
    %4 = vector.broadcast %0 : vector<1x128xf32> to vector<128x128xf32>
    %5 = arith.addf %4, %3 : vector<128x128xf32>
    %6 = arith.truncf %5 : vector<128x128xf32> to vector<128x128xbf16>
    %c0_5 = arith.constant 0 : index
    %c0_6 = arith.constant 0 : index
    %7 = vector.load %arg4[%c0_5, %c0_6] : memref<128x128xbf16, #tpu.memory_space<vmem>>, vector<128x128xbf16>
    tpu.vector_store %arg4[%c0_5, %c0_6], %6 {strides = array<i32>} : memref<128x128xbf16, #tpu.memory_space<vmem>>, vector<128x128xbf16>,
    return
  }
  func.func @transform_0(%arg0: i32) -> (i32, i32) {
    %c0_i32 = arith.constant 0 : i32
    %c0_i32_0 = arith.constant 0 : i32
    return %arg0, %c0_i32 : i32, i32
  }
  func.func @transform_1(%arg0: i32) -> (i32, i32) {
    %c0_i32 = arith.constant 0 : i32
    %c0_i32_0 = arith.constant 0 : i32
    %c0_i32_1 = arith.constant 0 : i32
    return %c0_i32, %c0_i32_0 : i32, i32
  }
  func.func @transform_2(%arg0: i32) -> (i32, i32) {
    %c0_i32 = arith.constant 0 : i32
    %c0_i32_0 = arith.constant 0 : i32
    %c0_i32_1 = arith.constant 0 : i32
    return %c0_i32, %c0_i32_0 : i32, i32
  }
  func.func @transform_3(%arg0: i32) -> (i32, i32) {
    %c0_i32 = arith.constant 0 : i32
    %c0_i32_0 = arith.constant 0 : i32
    return %arg0, %c0_i32 : i32, i32
  }
}

</mosaic_0001>

<bundles_post_ra>
// kernel: tpu_custom_call.1
= control target key start
LH: loop header
LB: loop body
LE: loop exit
PB: predicated region body
PF: predicated region fallthrough
CT: control target
= control target key end

     0   :  { %6 = vsyncpa [#allocation3], 0  ;;  %s482_s0 = inlined_call_operand.hbm [shape: f32[8,128], index: 0, kind: input, shape index: {}]   ;;  %s483_s1 = inlined_call_operand.hbm [shape: f32[16,128], index: 1, kind: output, shape index: {}]  }
   0x1   :  { %7 = vsyncpa [#allocation4], 0 }
   0x2   :  { %9 = vsyncpa [#allocation4 + $0x1], 0  ;;  %s352_s6 = smov 0   ;;  %s354_s7 = smov 0  }
   0x3   :  { %s356_s8 = smov 0   ;;  %s358_s9 = smov 0  }
   0x4 LB: > { %s373_s10 = sadd.s32 4294967295, %s338_s9   ;;  %s184_s11 = sadd.s32 4294967294, %s338_s9   ;;  %s338_s9 = sphi %s358_s9, %s499_s9   ;;  %s334_s8 = sphi %s356_s8, %s498_s8   ;;  %s330_s7 = sphi %s354_s7, %s497_s7   ;;  %s326_s6 = sphi %s352_s6, %s496_s6  }
   0x5   : > { %s377_s12 = sadd.s32 1, %s338_s9   ;;  %s43_s13 = sadd.s32 1, %s334_s8 }
   0x6   : > { %s40_s14 = ssub.s32 %s338_s9, %s377_s12  ;;  %p53_p0 = scmp.ne.s32.totalorder %s334_s8, %s330_s7 }
   0x7   : > { %p41_p1 = scmp.eq.s32.totalorder %s40_s14, 0  ;;  %p54_p2 = scmp.eq.s32.totalorder %s373_s10, 1 }
   0x8   : > { %p59_p3 = scmp.ne.s32.totalorder %s330_s7, %s326_s6  ;;  %p60_p4 = scmp.eq.s32.totalorder %s184_s11, 1 }
   0x9   : > { %s388_s15 = scalar_select %p41_p1, %s334_s8, %s43_s13  }
   0xa   : > { %p390_p5 = por %p54_p2, %p53_p0  ;;  %p394_p6 = por %p60_p4, %p59_p3 }
   0xb   : > { %p185_p7 = scmp.ge.s32.totalorder %s338_s9, 1  ;;  %p67_p8 = scmp.lt.s32.totalorder %s338_s9, 3 }
   0xc   : > { %s487_s16 = scalar_select %p390_p5, 1, 0 }
   0xd   : > { %s488_s17 = scalar_select %p394_p6, 1, 0 }
   0xe   : > { %p484_p9 = scmp.eq.s32.totalorder %s373_s10, 0  ;;  %p401_p10 = pnand %p185_p7, %p67_p8 }
   0xf   : > { %s340_s19 = smov [#allocation2]   ;;  %s244_s24 = scalar_lea.hbm %s482_s0, 128 }
  0x10   : > { %s489_s18 = scalar_select %p401_p10, 1, 0 }
  0x11   : > { %s80_s20 = sshll.u32 %s340_s19, 4  ;;  %p200_p11 = pneg %p401_p10  ;;  %s81_s20 = int_to_ptr.vmem [resolvable:$true] %s80_s20 }
  0x12   : > { %p245_p13 = scmp.ne.s32.totalorder %s482_s0, %s244_s24  ;;  %p251_p3 = scmp.lt.u32.totalorder %s244_s24, %s482_s0 }
  0x13   : > { %p409_p12 = pnand %p484_p9, %p200_p11 }
  0x15   : > { %p246_p0 = pneg %p409_p12 }
  0x17   : > { %p247_p1 = pnand %p246_p0, %p245_p13 }
  0x19   : > { %p248_p2 = pneg %p247_p1 }
  0x1b   : > { %p253_p4 = pnand %p251_p3, %p248_p2 }
  0x1d   : > { %256 = shalt.err (!%p253_p4)
}
  0x1e   : > { %s257_s29 = scalar_lea.vmem %s81_s20, 128  ;;  %p265_p9 = scmp.lt.s32.totalorder %s81_s20, %s81_s20 }
  0x1f   : > { %p258_p7 = scmp.ne.s32.totalorder %s81_s20, %s257_s29  ;;  %p266_p6 = scmp.lt.s32.totalorder %s257_s29, %s257_s29 }
  0x21   : > { %p260_p8 = pnand %p258_p7, %p246_p0  ;;  %p267_p5 = por %p266_p6, %p265_p9 }
  0x23   : > { %p261_p11 = pneg %p260_p8 }
  0x25   : > { %p268_p10 = pnand %p267_p5, %p261_p11 }
  0x27   : > { %271 = shalt.err (!%p268_p10)
}
  0x28   : > { %203 = dma.hbm_to_vmem [thread:$0]  (!%p409_p12), %s482_s0, 128, %s81_s20, [#allocation3]  }
  0x29   : > { %p491_p13 = scmp.ne.s32.totalorder %s489_s18, 0 }
  0x2a   : > { %p492_p1 = scmp.eq.s32.totalorder (!%p491_p13), %s373_s10, 0 }
  0x2b   : > { %93 = sbr.rel (%p491_p13) target bundleno = 77 (0x4d), region = 24 }
  0x32   : > { %317 = dma.done.wait (%p492_p1), [#allocation3], 128   ;;  %p493_p0 = pmov %p492_p1 }
  0x33   : > { %s105_s3 = sand.u32 1, %s330_s7   ;;  %s191_s13 = sshll.u32 %s373_s10, 7  ;;  %v108_v0 = vld [vmem:[#allocation2] sm:$0xff] }
  0x34   : > { %319 = vsyncadd (%p493_p0), [#allocation3], 4294967168  ;;  %s189_s4 = sshll.u32 %s105_s3, 3  ;;  %v109_v1 = vmul.f32 2.0, %v108_v0  ;;  %s442_s19 = scalar_lea.hbm %s483_s1, %s191_s13 }
  0x35   : > { %s107_s5 = scalar_lea.vmem [#allocation5], %s189_s4  ;;  %s112_s20 = scalar_lea.sflag [#allocation4], %s105_s3 }
  0x36   : > { %s125_s11 = sshll.u32 %s107_s5, 4  ;;  %110 = vst [vmem:[%s107_s5] sm:$0xff] %v109_v1  ;;  %p494_p6 = scmp.ne.s32.totalorder %s487_s16, 0  ;;  %s437_s11 = int_to_ptr.vmem [resolvable:$true] %s125_s11 }
  0x37   : > { %s272_s21 = scalar_lea.vmem %s437_s11, 128  ;;  %s341_s10 = smov [#allocation5]  }
  0x38   : > { %p273_p5 = scmp.ne.s32.totalorder %s437_s11, %s272_s21  ;;  %s276_s22 = sshll.u32 %s341_s10, 4  ;;  %s277_s22 = int_to_ptr.vmem [resolvable:$false] %s276_s22 }
  0x39   : > { %s278_s23 = scalar_lea.vmem %s277_s22, 256  ;;  %p279_p12 = scmp.lt.s32.totalorder %s437_s11, %s277_s22 }
  0x3a   : > { %p274_p9 = pnand %p273_p5, %p494_p6  ;;  %p280_p2 = scmp.lt.s32.totalorder %s278_s23, %s272_s21 }
  0x3c   : > { %p275_p10 = pneg %p274_p9  ;;  %p281_p3 = por %p280_p2, %p279_p12 }
  0x3e   : > { %p282_p4 = pnand %p281_p3, %p275_p10 }
  0x40   : > { %285 = shalt.err (!%p282_p4)
}
  0x41   : > { %s286_s24 = scalar_lea.hbm %s442_s19, 128  ;;  %s290_s27 = scalar_lea.hbm %s483_s1, 256 }
  0x42   : > { %p287_p7 = scmp.ne.s32.totalorder %s442_s19, %s286_s24  ;;  %p291_p13 = scmp.lt.u32.totalorder %s442_s19, %s483_s1 }
  0x43   : > { %p292_p1 = scmp.lt.u32.totalorder %s290_s27, %s286_s24  ;;  %p294_p5 = scmp.lt.u32.totalorder %s286_s24, %s442_s19 }
  0x44   : > { %p288_p8 = pnand %p287_p7, %p494_p6 }
  0x45   : > { %p293_p0 = por %p292_p1, %p291_p13 }
  0x46   : > { %p289_p11 = pneg %p288_p8 }
  0x47   : > { %p295_p9 = por %p294_p5, %p293_p0 }
  0x49   : > { %p296_p10 = pnand %p295_p9, %p289_p11 }
  0x4b   : > { %299 = shalt.err (!%p296_p10)
}
  0x4c   : > { %198 = dma.vmem_to_hbm [thread:$0]  (%p494_p6), %s437_s11, 128, %s442_s19, %s112_s20  }
  0x4d PF: > { %p210_p12 = scmp.ge.s32.totalorder %s338_s9, 2  ;;  %s137_s30 = sand.u32 1, %s326_s6  }
  0x4e   : > { %p495_p2 = scmp.ne.s32.totalorder %s488_s17, 0  ;;  %s138_s2 = scalar_lea.sflag [#allocation4], %s137_s30 }
  0x50   : > { %p205_p3 = pnand %p210_p12, %p495_p2 }
  0x52   : > { %321 = dma.done.wait (!%p205_p3), %s138_s2, 128  }
  0x53   : > { %323 = vsyncadd (!%p205_p3), %s138_s2, 4294967168  ;;  %p12_p4 = scmp.ge.s32.totalorder %s377_s12, 4   ;;  %s496_s6 = smov %s330_s7 }
  0x54   : > { %s497_s7 = smov %s334_s8  ;;  %s498_s8 = smov %s388_s15 }
  0x55   : > { %s499_s9 = smov %s377_s12  ;;  %14 = sbr.rel (!%p12_p4) target bundleno = 4 (0x4), region = 61 }
  0x5c   :  { %143 = vsyncpa [#allocation3], 1 }
  0x5d   :  { %145 = vsyncpa [#allocation3 + $0x1], 1 }
  0x5e   :  { %146 = vsyncpa [#allocation4], 1 }
  0x5f   :  { %148 = vsyncpa [#allocation4 + $0x1], 1 }

// kernel: tpu_custom_call.1
= control target key start
LH: loop header
LB: loop body
LE: loop exit
PB: predicated region body
PF: predicated region fallthrough
CT: control target
= control target key end

     0   :  { %8 = vsyncpa [#allocation3], 0  ;;  %s716_s0 = inlined_call_operand.hbm [shape: bf16[128,128], index: 0, kind: input, shape index: {}]   ;;  %s717_s1 = inlined_call_operand.hbm [shape: bf16[128,128], index: 1, kind: input, shape index: {}]   ;;  %s718_s2 = inlined_call_operand.vmem [shape: f32[1,128], index: 2, kind: input, shape index: {}]   ;;  %s719_s3 = inlined_call_operand.hbm [shape: bf16[128,128], index: 3, kind: output, shape index: {}]  }
   0x1   :  { %9 = vsyncpa [#allocation6], 0 }
   0x2   :  { %10 = vsyncpa [#allocation4], 0  ;;  %s643_s12 = smov [#allocation2]   ;;  %s571_s16 = scalar_lea.hbm %s716_s0, 1024 }
   0x3   :  { %s16_s13 = sshll.u32 %s643_s12, 4  ;;  %p572_p0 = scmp.ne.s32.totalorder %s716_s0, %s571_s16  ;;  %s17_s13 = int_to_ptr.vmem [resolvable:$true] %s16_s13 }
   0x4   :  { %p575_p1 = scmp.lt.u32.totalorder %s571_s16, %s716_s0 }
   0x6   :  { %p577_p2 = pnand %p575_p1, %p572_p0 }
   0x8   :  { %580 = shalt.err (!%p577_p2)
}
   0x9   :  { %s581_s21 = scalar_lea.vmem %s17_s13, 1024  ;;  %p586_p4 = scmp.lt.s32.totalorder %s17_s13, %s17_s13 }
   0xa   :  { %p582_p3 = scmp.ne.s32.totalorder %s17_s13, %s581_s21  ;;  %p587_p5 = scmp.lt.s32.totalorder %s581_s21, %s581_s21 }
   0xc   :  { %p588_p6 = por %p587_p5, %p586_p4 }
   0xe   :  { %p589_p7 = pnand %p588_p6, %p582_p3 }
  0x10   :  { %592 = shalt.err (!%p589_p7)
}
  0x11   :  { %s644_s22 = smov 64   ;;  %s645_s23 = smov 4  }
  0x12   :  { %22 = dma.hbm_to_vmem [thread:$0]  %s716_s0, 1024, %s17_s13, [#allocation3], %s644_s22, %s644_s22, %s645_s23  }
  0x13   :  { %s646_s26 = smov [#allocation5]   ;;  %s593_s30 = scalar_lea.hbm %s717_s1, 1024 }
  0x14   :  { %s28_s27 = sshll.u32 %s646_s26, 4  ;;  %p594_p8 = scmp.ne.s32.totalorder %s717_s1, %s593_s30  ;;  %s29_s27 = int_to_ptr.vmem [resolvable:$true] %s28_s27 }
  0x15   :  { %p597_p9 = scmp.lt.u32.totalorder %s593_s30, %s717_s1 }
  0x17   :  { %p599_p10 = pnand %p597_p9, %p594_p8 }
  0x19   :  { %602 = shalt.err (!%p599_p10)
}
  0x1a   :  { %s603_s8 = scalar_lea.vmem %s29_s27, 1024  ;;  %p608_p12 = scmp.lt.s32.totalorder %s29_s27, %s29_s27 }
  0x1b   :  { %p604_p11 = scmp.ne.s32.totalorder %s29_s27, %s603_s8  ;;  %p609_p13 = scmp.lt.s32.totalorder %s603_s8, %s603_s8 }
  0x1d   :  { %p610_p0 = por %p609_p13, %p608_p12 }
  0x1f   :  { %p611_p1 = pnand %p610_p0, %p604_p11 }
  0x21   :  { %614 = shalt.err (!%p611_p1)
}
  0x22   :  { %34 = dma.hbm_to_vmem [thread:$0]  %s717_s1, 1024, %s29_s27, [#allocation6], %s644_s22, %s644_s22, %s645_s23  }
  0x23   :  { %637 = dma.done.wait [#allocation3], 1024  }
  0x24   :  { %638 = vsyncadd [#allocation3], 4294966272 }
  0x25   :  { %639 = dma.done.wait [#allocation6], 1024  }
  0x26   :  { %640 = vsyncadd [#allocation6], 4294966272  ;;  %v555_v0 = vld [vmem:[#allocation5] sm:$0xff]   ;;  %v556_v1 = vld [vmem:[#allocation5 + $0x8] sm:$0xff]  }
  0x27   :  { %502 = vmatprep.subr.bf16.mxu0 %v555_v0  ;;  %534 = vmatprep.subr.bf16.mxu1 %v555_v0  ;;  %v557_v2 = vld [vmem:[#allocation5 + $0x10] sm:$0xff]   ;;  %v558_v3 = vld [vmem:[#allocation5 + $0x18] sm:$0xff]   ;;  %v563_v4 = vld [vmem:[#allocation2] sm:$0xff]  }
  0x28   :  { %503 = vmatpush3.bf16.msra.mxu0 %v555_v0  ;;  %542 = vmatpush3.bf16.msra.mxu1 %v555_v0  ;;  %v564_v5 = vld [vmem:[#allocation2 + $0x20] sm:$0xff]   ;;  %v560_v7 = vld [vmem:[#allocation5 + $0x28] sm:$0xff]   ;;  %v561_v8 = vld [vmem:[#allocation5 + $0x30] sm:$0xff]  }
  0x29   :  { %504 = vmatprep.subr.bf16.mxu0 %v556_v1  ;;  %535 = vmatprep.subr.bf16.mxu1 %v556_v1  ;;  %v559_v6 = vld [vmem:[#allocation5 + $0x20] sm:$0xff]   ;;  %v562_v9 = vld [vmem:[#allocation5 + $0x38] sm:$0xff]   ;;  %v565_v10 = vld [vmem:[#allocation2 + $0x8] sm:$0xff]  }
  0x2a   :  { %518 = vmatprep.mubr.bf16.mxu0 %v563_v4  ;;  %526 = vmatprep.mubr.bf16.mxu1 %v564_v5  ;;  %v566_v11 = vld [vmem:[#allocation2 + $0x28] sm:$0xff]   ;;  %v567_v12 = vld [vmem:[#allocation2 + $0x10] sm:$0xff]   ;;  %v569_v14 = vld [vmem:[#allocation2 + $0x18] sm:$0xff]  }
  0x2b   :  { %v568_v13 = vld [vmem:[#allocation2 + $0x30] sm:$0xff]   ;;  %v570_v15 = vld [vmem:[#allocation2 + $0x38] sm:$0xff]   ;;  %v406_v16 = vld [vmem:[%s718_s2] ss:$0 sm:$0xff]  ;;  %s647_s2 = smov [#allocation7]  }
  0x2c   :  { %505 = vmatpush3.bf16.msra.mxu0 %v556_v1  ;;  %543 = vmatpush3.bf16.msra.mxu1 %v556_v1  ;;  %s377_s11 = sshll.u32 %s647_s2, 4  ;;  %s378_s11 = int_to_ptr.vmem [resolvable:$true] %s377_s11 }
  0x2d   :  { %506 = vmatprep.subr.bf16.mxu0 %v557_v2  ;;  %536 = vmatprep.subr.bf16.mxu1 %v557_v2  ;;  %s615_s12 = scalar_lea.vmem %s378_s11, 1024  ;;  %p620_p3 = scmp.lt.s32.totalorder %s378_s11, %s378_s11 }
  0x2e   :  { %p616_p2 = scmp.ne.s32.totalorder %s378_s11, %s615_s12  ;;  %p621_p4 = scmp.lt.s32.totalorder %s615_s12, %s615_s12 }
  0x30   :  { %507 = vmatpush3.bf16.msra.mxu0 %v557_v2  ;;  %544 = vmatpush3.bf16.msra.mxu1 %v557_v2  ;;  %p622_p5 = por %p621_p4, %p620_p3 }
  0x31   :  { %508 = vmatprep.subr.bf16.mxu0 %v558_v3  ;;  %537 = vmatprep.subr.bf16.mxu1 %v558_v3 }
  0x32   :  { %p623_p6 = pnand %p622_p5, %p616_p2 }
  0x34   :  { %509 = vmatpush3.bf16.msra.mxu0 %v558_v3  ;;  %545 = vmatpush3.bf16.msra.mxu1 %v558_v3 }
  0x35   :  { %510 = vmatprep.subr.bf16.mxu0 %v559_v6  ;;  %538 = vmatprep.subr.bf16.mxu1 %v559_v6 }
  0x38   :  { %511 = vmatpush3.bf16.msra.mxu0 %v559_v6  ;;  %546 = vmatpush3.bf16.msra.mxu1 %v559_v6 }
  0x39   :  { %512 = vmatprep.subr.bf16.mxu0 %v560_v7  ;;  %539 = vmatprep.subr.bf16.mxu1 %v560_v7 }
  0x3c   :  { %513 = vmatpush3.bf16.msra.mxu0 %v560_v7  ;;  %547 = vmatpush3.bf16.msra.mxu1 %v560_v7 }
  0x3d   :  { %514 = vmatprep.subr.bf16.mxu0 %v561_v8  ;;  %540 = vmatprep.subr.bf16.mxu1 %v561_v8 }
  0x40   :  { %515 = vmatpush3.bf16.msra.mxu0 %v561_v8  ;;  %548 = vmatpush3.bf16.msra.mxu1 %v561_v8 }
  0x41   :  { %516 = vmatprep.subr.bf16.mxu0 %v562_v9  ;;  %541 = vmatprep.subr.bf16.mxu1 %v562_v9 }
  0x44   :  { %517 = vmatpush3.bf16.msra.mxu0 %v562_v9  ;;  %549 = vmatpush3.bf16.msra.mxu1 %v562_v9 }
  0x47   :  { %519 = vmatmul.mubr.bf16.vlgmr.msra.gmra.mrb[0].mxu0 %v565_v10  ;;  %527 = vmatmul.mubr.bf16.vlgmr.msra.gmra.mrb[0].mxu1 %v566_v11 }
  0x48   :  { %522 = vmatprep.mubr.bf16.mxu0 %v567_v12  ;;  %530 = vmatprep.mubr.bf16.mxu1 %v568_v13 }
  0x4f   :  { %523 = vmatmul.mubr.bf16.gmra.mrb[4].mxu0 %v569_v14  ;;  %531 = vmatmul.mubr.bf16.gmra.mrb[4].mxu1 %v570_v15 }
 0x11a   :  { %v520_v17 = vpop.f32.mrb[0].mxu0  ;;  %v528_v18 = vpop.f32.mrb[0].mxu1 }
 0x11b   :  { %v207_v19 = vpop.f32.mrb[1].mxu0  ;;  %v239_v20 = vpop.f32.mrb[1].mxu1  ;;  %v278_v23 = vadd.f32 %v520_v17, %v406_v16  ;;  %v286_v24 = vadd.f32 %v528_v18, %v406_v16 }
 0x11c   :  { %v521_v21 = vpop.f32.mrb[2].mxu0  ;;  %v529_v22 = vpop.f32.mrb[2].mxu1  ;;  %v276_v29 = vadd.f32 %v406_v16, %v207_v19  ;;  %v284_v30 = vadd.f32 %v406_v16, %v239_v20 }
 0x11d   :  { %v279_v25 = vadd.f32 %v521_v21, %v406_v16  ;;  %v287_v26 = vadd.f32 %v529_v22, %v406_v16  ;;  %v210_v27 = vpop.f32.mrb[3].mxu0  ;;  %v242_v28 = vpop.f32.mrb[3].mxu1 }
 0x11e   :  { %v277_v31 = vadd.f32 %v406_v16, %v210_v27  ;;  %v285_v32 = vadd.f32 %v406_v16, %v242_v28 }
 0x11f   :  { %v447_v33 = vpack.c.bf16 %v279_v25, %v278_v23  ;;  %v467_v34 = vpack.c.bf16 %v287_v26, %v286_v24 }
 0x120   :  { %v442_v35 = vpack.c.bf16 %v277_v31, %v276_v29  ;;  %v462_v36 = vpack.c.bf16 %v285_v32, %v284_v30 }
 0x121   :  { %479 = vst [vmem:[#allocation7 + $0x8] sm:$0xff] %v447_v33   ;;  %483 = vst [vmem:[#allocation7 + $0x28] sm:$0xff] %v467_v34  }
 0x122   :  { %443 = vst [vmem:[#allocation7] sm:$0xff] %v442_v35   ;;  %482 = vst [vmem:[#allocation7 + $0x20] sm:$0xff] %v462_v36   ;;  %v524_v37 = vpop.f32.mrb[4].mxu0  ;;  %v532_v38 = vpop.f32.mrb[4].mxu1 }
 0x123   :  { %v223_v39 = vpop.f32.mrb[5].mxu0  ;;  %v255_v40 = vpop.f32.mrb[5].mxu1  ;;  %v282_v43 = vadd.f32 %v524_v37, %v406_v16  ;;  %v290_v44 = vadd.f32 %v532_v38, %v406_v16 }
 0x124   :  { %v525_v41 = vpop.f32.mrb[6].mxu0  ;;  %v533_v42 = vpop.f32.mrb[6].mxu1  ;;  %v280_v49 = vadd.f32 %v406_v16, %v223_v39  ;;  %v288_v50 = vadd.f32 %v406_v16, %v255_v40 }
 0x125   :  { %v283_v45 = vadd.f32 %v525_v41, %v406_v16  ;;  %v291_v46 = vadd.f32 %v533_v42, %v406_v16  ;;  %v226_v47 = vpop.f32.mrb[7].mxu0  ;;  %v258_v48 = vpop.f32.mrb[7].mxu1 }
 0x126   :  { %v281_v51 = vadd.f32 %v406_v16, %v226_v47  ;;  %v289_v52 = vadd.f32 %v406_v16, %v258_v48 }
 0x127   :  { %v457_v53 = vpack.c.bf16 %v283_v45, %v282_v43  ;;  %v477_v54 = vpack.c.bf16 %v291_v46, %v290_v44 }
 0x128   :  { %v452_v55 = vpack.c.bf16 %v281_v51, %v280_v49  ;;  %v472_v56 = vpack.c.bf16 %v289_v52, %v288_v50 }
 0x129   :  { %481 = vst [vmem:[#allocation7 + $0x18] sm:$0xff] %v457_v53   ;;  %485 = vst [vmem:[#allocation7 + $0x38] sm:$0xff] %v477_v54  }
 0x12a   :  { %480 = vst [vmem:[#allocation7 + $0x10] sm:$0xff] %v452_v55   ;;  %484 = vst [vmem:[#allocation7 + $0x30] sm:$0xff] %v472_v56  }
 0x12b   :  { %626 = shalt.err (!%p623_p6)
}
 0x12c   :  { %s627_s15 = scalar_lea.hbm %s719_s3, 1024 }
 0x12d   :  { %p628_p7 = scmp.ne.s32.totalorder %s719_s3, %s627_s15  ;;  %p631_p8 = scmp.lt.u32.totalorder %s627_s15, %s719_s3 }
 0x12f   :  { %p633_p9 = pnand %p631_p8, %p628_p7 }
 0x131   :  { %636 = shalt.err (!%p633_p9)
}
 0x132   :  { %383 = dma.vmem_to_hbm [thread:$0]  %s378_s11, 1024, %s719_s3, [#allocation4], %s644_s22, %s644_s22, %s645_s23  }
 0x133   :  { %641 = dma.done.wait [#allocation4], 1024  }
 0x134   :  { %642 = vsyncadd [#allocation4], 4294966272 }
 0x135   :  { %387 = vsyncpa [#allocation3], 1 }
 0x136   :  { %388 = vsyncpa [#allocation6], 1 }
 0x137   :  { %389 = vsyncpa [#allocation4], 1 }

</bundles_post_ra>
